<compile_context>
chip_gen: v7x
topology: tpu7x:2x2x1
jax: 0.10.0
libtpu: 0.0.40
codegen_flags: <defaults>
</compile_context>

<pallas_src>
import jax
import jax.numpy as jnp
from jax import lax
from jax.experimental import pallas as pl
from jax.experimental.pallas import tpu as pltpu


def _vmem_caps():
    """Returns (vmem_limit_bytes, tile_budget_bytes), generation-aware."""
    cap = 64 * 1024 * 1024  # conservative default (v7x per-core VMEM)
    try:
        info = pltpu.get_tpu_info()
        cap = int(getattr(info, "vmem_capacity_bytes", cap) or cap)
    except Exception:
        pass
    if cap >= 128 * 1024 * 1024:                       # v5e / v6e
        return 96 * 1024 * 1024, 80 * 1024 * 1024
    return 40 * 1024 * 1024, 32 * 1024 * 1024          # v7x (64 MiB per core)


def _divisors(n):
    return [d for d in range(1, n + 1) if n % d == 0]


def _pick_tiles(D, C, H, W, in_itemsize, out_itemsize, budget):
    """Pick (tH, tD) for the flattened (H*W) trailing-axis layout.

    (8, 128)-rule constraints on the last two block dims:
      * input  block (1, C, tH*W):      C == full C;  tH*W % 128 == 0 or tH == H
      * output block (1, 2C, tD, tH*W): tD % 8 == 0 or tD == D
    """
    # Disparity chunk: it sits in the sublane position of the output block, so
    # it must be a multiple of 8 or the full D axis.  8 keeps the static
    # unroll small; the slab is already multi-MiB at realistic C*H*W so a
    # larger tD buys essentially nothing.  If D has no multiple-of-8 divisor,
    # the whole D axis must be a single block (the unroll is then D).
    tD = 8 if D % 8 == 0 else D

    def vmem_bytes(tH):
        inputs = 2 * 2 * C * tH * W * in_itemsize                # 2 tensors x 2 bufs
        output = 2 * 2 * C * tD * tH * W * out_itemsize          # slab x 2 bufs
        temps = 2 * C * tH * W * max(in_itemsize, out_itemsize)  # roll/select temps
        return inputs + output + temps

    h_cands = [H] + sorted(
        [t for t in _divisors(H) if t != H and (t * W) % 128 == 0], reverse=True)
    for tH in h_cands:
        if vmem_bytes(tH) <= budget:
            return tH, tD
    # Nothing fits the budget: take the smallest legal tile and rely on the
    # raised VMEM limit.
    # TODO(synk): extreme C*H*W would additionally need channel tiling; not
    #             implemented (not reachable at PSMNet-scale feature maps).
    return h_cands[-1], tD


def make_cost_volume(max_slide: int, stride: int = 1, out_dtype=None):
    """Returns a callable(left, right) -> (B, 2C, D, H, W) cost volume."""
    D = max_slide // stride
    assert D >= 1, "max_slide // stride must be >= 1"

    def cost_volume(left_feats: jax.Array, right_feats: jax.Array) -> jax.Array:
        B, C, H, W = left_feats.shape
        assert right_feats.shape == (B, C, H, W)
        in_dtype = left_feats.dtype
        odtype = jnp.dtype(out_dtype) if out_dtype is not None else in_dtype

        vmem_limit, budget = _vmem_caps()
        tH, tD = _pick_tiles(D, C, H, W, in_dtype.itemsize, odtype.itemsize, budget)
        tHW = tH * W
        HW = H * W

        # Lane-dense layout: fold (H, W) into one trailing axis (free reshape).
        left2 = left_feats.reshape(B, C, HW)
        right2 = right_feats.reshape(B, C, HW)

        # Only needed if a shift could reach past one tile (max_slide >> W).
        needs_mod = (D - 1) * stride >= tHW

        def kernel(left_ref, right_ref, out_ref):
            # left_ref/right_ref: (1, C, tH*W) VMEM, resident across the D axis.
            # out_ref:            (1, 2C, tD, tH*W) output slab.
            d_chunk = pl.program_id(2)
            # Column index within the original W axis, computed once at
            # (1, tH*W); jnp.where broadcasts it over the channel axis.
            col = lax.broadcasted_iota(jnp.int32, (1, tHW), 1) % W
            zero = jnp.zeros((), in_dtype)

            for j in range(tD):  # static unroll (== 8 whenever D % 8 == 0)
                shift = (d_chunk * tD + j) * stride
                valid = col >= shift                          # (1, tH*W) bool
                # Left half: masked copy (ref read per use, not hoisted).
                out_ref[0, 0:C, j] = jnp.where(
                    valid, left_ref[0], zero).astype(out_ref.dtype)
                # Right half: roll along the flattened axis (XLU); wrap-around
                # only touches the masked-to-zero region, so it is harmless.
                roll_shift = shift % tHW if needs_mod else shift
                shifted = pltpu.roll(right_ref[0], roll_shift, axis=1)
                out_ref[0, C:2 * C, j] = jnp.where(
                    valid, shifted, zero).astype(out_ref.dtype)

        out_bytes = B * 2 * C * D * HW * odtype.itemsize
        in_bytes = 2 * B * C * HW * in_dtype.itemsize

        out = pl.pallas_call(
            kernel,
            out_shape=jax.ShapeDtypeStruct((B, 2 * C, D, HW), odtype),
            grid=(B, H // tH, D // tD),
            in_specs=[
                # index_map independent of the D axis -> inputs are DMA'd once
                # per (b, h-tile) and stay resident across all disparities.
                # (pl.Buffered(1) on these would also drop the unused input
                #  double-buffer; left at the default for portability.)
                pl.BlockSpec((1, C, tHW), lambda b, h, d: (b, 0, h)),
                pl.BlockSpec((1, C, tHW), lambda b, h, d: (b, 0, h)),
            ],
            out_specs=pl.BlockSpec(
                (1, 2 * C, tD, tHW), lambda b, h, d: (b, 0, d, h)),
            compiler_params=pltpu.CompilerParams(
                # B and H tiles are independent, so megacore / v7x dual-TC can
                # shard them; D chunks stay sequential ("arbitrary") so the
                # inputs remain resident per core.
                dimension_semantics=("parallel", "parallel", "arbitrary"),
                vmem_limit_bytes=vmem_limit,
            ),
            cost_estimate=pl.CostEstimate(
                flops=0, transcendentals=0,
                bytes_accessed=out_bytes + in_bytes),
        )(left2, right2)

        return out.reshape(B, 2 * C, D, H, W)

    return cost_volume


def cost_volume_ref(left, right, max_slide, stride=1):
    """Pure-JAX reference mirroring the PyTorch forward (zero-filled)."""
    B, C, H, W = left.shape
    D = max_slide // stride
    cost = jnp.zeros((B, 2 * C, D, H, W), left.dtype)
    for i in range(D):
        s = i * stride
        if s == 0:
            cost = cost.at[:, :C, i].set(left)
            cost = cost.at[:, C:, i].set(right)
        else:
            cost = cost.at[:, :C, i, :, s:].set(left[:, :, :, s:])
            cost = cost.at[:, C:, i, :, s:].set(right[:, :, :, :-s])
    return cost


if __name__ == "__main__":
    key = jax.random.PRNGKey(0)
    k1, k2, k3, k4 = jax.random.split(key, 4)

    # Case 1: shapes consistent with the module's forward.
    B, C, H, W = 2, 4, 16, 16
    max_slide, stride = 8, 1
    left = jax.random.normal(k1, (B, C, H, W), dtype=jnp.float32)
    right = jax.random.normal(k2, (B, C, H, W), dtype=jnp.float32)
    out = jax.block_until_ready(make_cost_volume(max_slide, stride)(left, right))
    ref = cost_volume_ref(left, right, max_slide, stride)
    assert out.shape == (B, 2 * C, max_slide // stride, H, W), out.shape
    assert jnp.array_equal(out, ref), "case-1 mismatch vs reference"

    # Case 2: W not a multiple of 128, stride > 1, D not a multiple of 8 —
    # exercises the flattened roll/mask math and the tD == D block path.
    B2, C2, H2, W2 = 1, 3, 8, 24
    max_slide2, stride2 = 6, 2
    left_b = jax.random.normal(k3, (B2, C2, H2, W2), dtype=jnp.float32)
    right_b = jax.random.normal(k4, (B2, C2, H2, W2), dtype=jnp.float32)
    out2 = jax.block_until_ready(
        make_cost_volume(max_slide2, stride2)(left_b, right_b))
    ref2 = cost_volume_ref(left_b, right_b, max_slide2, stride2)
    assert out2.shape == (B2, 2 * C2, max_slide2 // stride2, H2, W2), out2.shape
    assert jnp.array_equal(out2, ref2), "case-2 mismatch vs reference"

    print("KERNEL_OK")
</pallas_src>

<mosaic_0001>
module attributes {stable_mosaic.version = 11 : i64} {
  func.func @kernel(%arg0: i32, %arg1: i32, %arg2: i32, %arg3: memref<1x4x256xf32, #tpu.memory_space<vmem>>, %arg4: memref<1x4x256xf32, #tpu.memory_space<vmem>>, %arg5: memref<1x8x8x256xf32, #tpu.memory_space<vmem>>) attributes {dimension_semantics = [#tpu.dimension_semantics<parallel>, #tpu.dimension_semantics<parallel>, #tpu.dimension_semantics<arbitrary>], iteration_bounds = array<i64: 2, 1, 1>, scalar_prefetch = 0 : i64, scratch_operands = 0 : i64, tpu.core_type = #tpu.core_type<tc>, window_params = [{transform_indices = @transform_0, window_bounds = array<i64: 1, 4, 256>}, {transform_indices = @transform_1, window_bounds = array<i64: 1, 4, 256>}, {transform_indices = @transform_2, window_bounds = array<i64: 1, 8, 8, 256>}]} {
    %0 = tpu.iota {dimensions = array<i32: 1>} : vector<1x256xi32>
    %c16_i32 = arith.constant 16 : i32
    %c0_i32 = arith.constant 0 : i32
    %1 = arith.cmpi eq, %c16_i32, %c0_i32 : i32
    %c1_i32 = arith.constant 1 : i32
    %2 = arith.select %1, %c1_i32, %c16_i32 : i32
    %3 = vector.broadcast %2 : i32 to vector<1x256xi32>
    %4 = arith.remsi %0, %3 : vector<1x256xi32>
    %c0_i32_0 = arith.constant 0 : i32
    %5 = vector.broadcast %c0_i32_0 : i32 to vector<1x256xi32>
    %6 = arith.cmpi ne, %4, %5 : vector<1x256xi32>
    %c0_i32_1 = arith.constant 0 : i32
    %7 = vector.broadcast %c0_i32_1 : i32 to vector<1x256xi32>
    %8 = arith.cmpi slt, %4, %7 : vector<1x256xi32>
    %c0_i32_2 = arith.constant 0 : i32
    %9 = arith.cmpi slt, %2, %c0_i32_2 : i32
    %10 = vector.broadcast %9 : i1 to vector<1x256xi1>
    %11 = vector.broadcast %10 : vector<1x256xi1> to vector<1x256xi1>
    %12 = arith.xori %8, %11 : vector<1x256xi1>
    %13 = arith.andi %12, %6 : vector<1x256xi1>
    %14 = vector.broadcast %2 : i32 to vector<1x256xi32>
    %15 = arith.addi %4, %14 : vector<1x256xi32>
    %16 = arith.select %13, %15, %4 : vector<1x256xi1>, vector<1x256xi32>
    %c8_i32 = arith.constant 8 : i32
    %17 = arith.muli %arg2, %c8_i32 : i32
    %c0_i32_3 = arith.constant 0 : i32
    %18 = arith.addi %17, %c0_i32_3 : i32
    %c1_i32_4 = arith.constant 1 : i32
    %19 = arith.muli %18, %c1_i32_4 : i32
    %20 = vector.broadcast %19 : i32 to vector<1x256xi32>
    %21 = arith.cmpi sge, %16, %20 : vector<1x256xi32>
    %c0 = arith.constant 0 : index
    %c0_5 = arith.constant 0 : index
    %c0_6 = arith.constant 0 : index
    %22 = vector.load %arg3[%c0, %c0_5, %c0_6] : memref<1x4x256xf32, #tpu.memory_space<vmem>>, vector<1x4x256xf32>
    %23 = vector.shape_cast %22 : vector<1x4x256xf32> to vector<4x256xf32>
    %cst = arith.constant 0.000000e+00 : f32
    %24 = vector.shape_cast %21 : vector<1x256xi1> to vector<1x256xi1>
    %25 = vector.broadcast %24 : vector<1x256xi1> to vector<4x256xi1>
    %26 = vector.broadcast %cst : f32 to vector<4x256xf32>
    %27 = arith.select %25, %23, %26 : vector<4x256xi1>, vector<4x256xf32>
    %c0_7 = arith.constant 0 : index
    %c0_8 = arith.constant 0 : index
    %c0_9 = arith.constant 0 : index
    %c0_10 = arith.constant 0 : index
    %28 = vector.load %arg5[%c0_7, %c0_8, %c0_9, %c0_10] : memref<1x8x8x256xf32, #tpu.memory_space<vmem>>, vector<1x4x1x256xf32>
    %29 = vector.shape_cast %28 : vector<1x4x1x256xf32> to vector<4x256xf32>
    %30 = vector.shape_cast %27 : vector<4x256xf32> to vector<1x4x1x256xf32>
    tpu.vector_store %arg5[%c0_7, %c0_8, %c0_9, %c0_10], %30 {strides = array<i32>} : memref<1x8x8x256xf32, #tpu.memory_space<vmem>>, vector<1x4x1x256xf32>,
    %c0_11 = arith.constant 0 : index
    %c0_12 = arith.constant 0 : index
    %c0_13 = arith.constant 0 : index
    %31 = vector.load %arg4[%c0_11, %c0_12, %c0_13] : memref<1x4x256xf32, #tpu.memory_space<vmem>>, vector<1x4x256xf32>
    %32 = vector.shape_cast %31 : vector<1x4x256xf32> to vector<4x256xf32>
    %33 = tpu.dynamic_rotate %32 by %19 dim 1 : vector<4x256xf32>, i32 -> vector<4x256xf32>
    %cst_14 = arith.constant 0.000000e+00 : f32
    %34 = vector.shape_cast %21 : vector<1x256xi1> to vector<1x256xi1>
    %35 = vector.broadcast %34 : vector<1x256xi1> to vector<4x256xi1>
    %36 = vector.broadcast %cst_14 : f32 to vector<4x256xf32>
    %37 = arith.select %35, %33, %36 : vector<4x256xi1>, vector<4x256xf32>
    %c0_15 = arith.constant 0 : index
    %c4 = arith.constant 4 : index
    %c0_16 = arith.constant 0 : index
    %c0_17 = arith.constant 0 : index
    %38 = vector.load %arg5[%c0_15, %c4, %c0_16, %c0_17] : memref<1x8x8x256xf32, #tpu.memory_space<vmem>>, vector<1x4x1x256xf32>
    %39 = vector.shape_cast %38 : vector<1x4x1x256xf32> to vector<4x256xf32>
    %40 = vector.shape_cast %37 : vector<4x256xf32> to vector<1x4x1x256xf32>
    tpu.vector_store %arg5[%c0_15, %c4, %c0_16, %c0_17], %40 {strides = array<i32>} : memref<1x8x8x256xf32, #tpu.memory_space<vmem>>, vector<1x4x1x256xf32>,
    %c8_i32_18 = arith.constant 8 : i32
    %41 = arith.muli %arg2, %c8_i32_18 : i32
    %c1_i32_19 = arith.constant 1 : i32
    %42 = arith.addi %41, %c1_i32_19 : i32
    %c1_i32_20 = arith.constant 1 : i32
    %43 = arith.muli %42, %c1_i32_20 : i32
    %44 = vector.broadcast %43 : i32 to vector<1x256xi32>
    %45 = arith.cmpi sge, %16, %44 : vector<1x256xi32>
    %c0_21 = arith.constant 0 : index
    %c0_22 = arith.constant 0 : index
    %c0_23 = arith.constant 0 : index
    %46 = vector.load %arg3[%c0_21, %c0_22, %c0_23] : memref<1x4x256xf32, #tpu.memory_space<vmem>>, vector<1x4x256xf32>
    %47 = vector.shape_cast %46 : vector<1x4x256xf32> to vector<4x256xf32>
    %cst_24 = arith.constant 0.000000e+00 : f32
    %48 = vector.shape_cast %45 : vector<1x256xi1> to vector<1x256xi1>
    %49 = vector.broadcast %48 : vector<1x256xi1> to vector<4x256xi1>
    %50 = vector.broadcast %cst_24 : f32 to vector<4x256xf32>
    %51 = arith.select %49, %47, %50 : vector<4x256xi1>, vector<4x256xf32>
    %c0_25 = arith.constant 0 : index
    %c0_26 = arith.constant 0 : index
    %c1 = arith.constant 1 : index
    %c0_27 = arith.constant 0 : index
    %52 = vector.load %arg5[%c0_25, %c0_26, %c1, %c0_27] : memref<1x8x8x256xf32, #tpu.memory_space<vmem>>, vector<1x4x1x256xf32>
    %53 = vector.shape_cast %52 : vector<1x4x1x256xf32> to vector<4x256xf32>
    %54 = vector.shape_cast %51 : vector<4x256xf32> to vector<1x4x1x256xf32>
    tpu.vector_store %arg5[%c0_25, %c0_26, %c1, %c0_27], %54 {strides = array<i32>} : memref<1x8x8x256xf32, #tpu.memory_space<vmem>>, vector<1x4x1x256xf32>,
    %c0_28 = arith.constant 0 : index
    %c0_29 = arith.constant 0 : index
    %c0_30 = arith.constant 0 : index
    %55 = vector.load %arg4[%c0_28, %c0_29, %c0_30] : memref<1x4x256xf32, #tpu.memory_space<vmem>>, vector<1x4x256xf32>
    %56 = vector.shape_cast %55 : vector<1x4x256xf32> to vector<4x256xf32>
    %57 = tpu.dynamic_rotate %56 by %43 dim 1 : vector<4x256xf32>, i32 -> vector<4x256xf32>
    %cst_31 = arith.constant 0.000000e+00 : f32
    %58 = vector.shape_cast %45 : vector<1x256xi1> to vector<1x256xi1>
    %59 = vector.broadcast %58 : vector<1x256xi1> to vector<4x256xi1>
    %60 = vector.broadcast %cst_31 : f32 to vector<4x256xf32>
    %61 = arith.select %59, %57, %60 : vector<4x256xi1>, vector<4x256xf32>
    %c0_32 = arith.constant 0 : index
    %c4_33 = arith.constant 4 : index
    %c1_34 = arith.constant 1 : index
    %c0_35 = arith.constant 0 : index
    %62 = vector.load %arg5[%c0_32, %c4_33, %c1_34, %c0_35] : memref<1x8x8x256xf32, #tpu.memory_space<vmem>>, vector<1x4x1x256xf32>
    %63 = vector.shape_cast %62 : vector<1x4x1x256xf32> to vector<4x256xf32>
    %64 = vector.shape_cast %61 : vector<4x256xf32> to vector<1x4x1x256xf32>
    tpu.vector_store %arg5[%c0_32, %c4_33, %c1_34, %c0_35], %64 {strides = array<i32>} : memref<1x8x8x256xf32, #tpu.memory_space<vmem>>, vector<1x4x1x256xf32>,
    %c8_i32_36 = arith.constant 8 : i32
    %65 = arith.muli %arg2, %c8_i32_36 : i32
    %c2_i32 = arith.constant 2 : i32
    %66 = arith.addi %65, %c2_i32 : i32
    %c1_i32_37 = arith.constant 1 : i32
    %67 = arith.muli %66, %c1_i32_37 : i32
    %68 = vector.broadcast %67 : i32 to vector<1x256xi32>
    %69 = arith.cmpi sge, %16, %68 : vector<1x256xi32>
    %c0_38 = arith.constant 0 : index
    %c0_39 = arith.constant 0 : index
    %c0_40 = arith.constant 0 : index
    %70 = vector.load %arg3[%c0_38, %c0_39, %c0_40] : memref<1x4x256xf32, #tpu.memory_space<vmem>>, vector<1x4x256xf32>
    %71 = vector.shape_cast %70 : vector<1x4x256xf32> to vector<4x256xf32>
    %cst_41 = arith.constant 0.000000e+00 : f32
    %72 = vector.shape_cast %69 : vector<1x256xi1> to vector<1x256xi1>
    %73 = vector.broadcast %72 : vector<1x256xi1> to vector<4x256xi1>
    %74 = vector.broadcast %cst_41 : f32 to vector<4x256xf32>
    %75 = arith.select %73, %71, %74 : vector<4x256xi1>, vector<4x256xf32>
    %c0_42 = arith.constant 0 : index
    %c0_43 = arith.constant 0 : index
    %c2 = arith.constant 2 : index
    %c0_44 = arith.constant 0 : index
    %76 = vector.load %arg5[%c0_42, %c0_43, %c2, %c0_44] : memref<1x8x8x256xf32, #tpu.memory_space<vmem>>, vector<1x4x1x256xf32>
    %77 = vector.shape_cast %76 : vector<1x4x1x256xf32> to vector<4x256xf32>
    %78 = vector.shape_cast %75 : vector<4x256xf32> to vector<1x4x1x256xf32>
    tpu.vector_store %arg5[%c0_42, %c0_43, %c2, %c0_44], %78 {strides = array<i32>} : memref<1x8x8x256xf32, #tpu.memory_space<vmem>>, vector<1x4x1x256xf32>,
    %c0_45 = arith.constant 0 : index
    %c0_46 = arith.constant 0 : index
    %c0_47 = arith.constant 0 : index
    %79 = vector.load %arg4[%c0_45, %c0_46, %c0_47] : memref<1x4x256xf32, #tpu.memory_space<vmem>>, vector<1x4x256xf32>
    %80 = vector.shape_cast %79 : vector<1x4x256xf32> to vector<4x256xf32>
    %81 = tpu.dynamic_rotate %80 by %67 dim 1 : vector<4x256xf32>, i32 -> vector<4x256xf32>
    %cst_48 = arith.constant 0.000000e+00 : f32
    %82 = vector.shape_cast %69 : vector<1x256xi1> to vector<1x256xi1>
    %83 = vector.broadcast %82 : vector<1x256xi1> to vector<4x256xi1>
    %84 = vector.broadcast %cst_48 : f32 to vector<4x256xf32>
    %85 = arith.select %83, %81, %84 : vector<4x256xi1>, vector<4x256xf32>
    %c0_49 = arith.constant 0 : index
    %c4_50 = arith.constant 4 : index
    %c2_51 = arith.constant 2 : index
    %c0_52 = arith.constant 0 : index
    %86 = vector.load %arg5[%c0_49, %c4_50, %c2_51, %c0_52] : memref<1x8x8x256xf32, #tpu.memory_space<vmem>>, vector<1x4x1x256xf32>
    %87 = vector.shape_cast %86 : vector<1x4x1x256xf32> to vector<4x256xf32>
    %88 = vector.shape_cast %85 : vector<4x256xf32> to vector<1x4x1x256xf32>
    tpu.vector_store %arg5[%c0_49, %c4_50, %c2_51, %c0_52], %88 {strides = array<i32>} : memref<1x8x8x256xf32, #tpu.memory_space<vmem>>, vector<1x4x1x256xf32>,
    %c8_i32_53 = arith.constant 8 : i32
    %89 = arith.muli %arg2, %c8_i32_53 : i32
    %c3_i32 = arith.constant 3 : i32
    %90 = arith.addi %89, %c3_i32 : i32
    %c1_i32_54 = arith.constant 1 : i32
    %91 = arith.muli %90, %c1_i32_54 : i32
    %92 = vector.broadcast %91 : i32 to vector<1x256xi32>
    %93 = arith.cmpi sge, %16, %92 : vector<1x256xi32>
    %c0_55 = arith.constant 0 : index
    %c0_56 = arith.constant 0 : index
    %c0_57 = arith.constant 0 : index
    %94 = vector.load %arg3[%c0_55, %c0_56, %c0_57] : memref<1x4x256xf32, #tpu.memory_space<vmem>>, vector<1x4x256xf32>
    %95 = vector.shape_cast %94 : vector<1x4x256xf32> to vector<4x256xf32>
    %cst_58 = arith.constant 0.000000e+00 : f32
    %96 = vector.shape_cast %93 : vector<1x256xi1> to vector<1x256xi1>
    %97 = vector.broadcast %96 : vector<1x256xi1> to vector<4x256xi1>
    %98 = vector.broadcast %cst_58 : f32 to vector<4x256xf32>
    %99 = arith.select %97, %95, %98 : vector<4x256xi1>, vector<4x256xf32>
    %c0_59 = arith.constant 0 : index
    %c0_60 = arith.constant 0 : index
    %c3 = arith.constant 3 : index
    %c0_61 = arith.constant 0 : index
    %100 = vector.load %arg5[%c0_59, %c0_60, %c3, %c0_61] : memref<1x8x8x256xf32, #tpu.memory_space<vmem>>, vector<1x4x1x256xf32>
    %101 = vector.shape_cast %100 : vector<1x4x1x256xf32> to vector<4x256xf32>
    %102 = vector.shape_cast %99 : vector<4x256xf32> to vector<1x4x1x256xf32>
    tpu.vector_store %arg5[%c0_59, %c0_60, %c3, %c0_61], %102 {strides = array<i32>} : memref<1x8x8x256xf32, #tpu.memory_space<vmem>>, vector<1x4x1x256xf32>,
    %c0_62 = arith.constant 0 : index
    %c0_63 = arith.constant 0 : index
    %c0_64 = arith.constant 0 : index
    %103 = vector.load %arg4[%c0_62, %c0_63, %c0_64] : memref<1x4x256xf32, #tpu.memory_space<vmem>>, vector<1x4x256xf32>
    %104 = vector.shape_cast %103 : vector<1x4x256xf32> to vector<4x256xf32>
    %105 = tpu.dynamic_rotate %104 by %91 dim 1 : vector<4x256xf32>, i32 -> vector<4x256xf32>
    %cst_65 = arith.constant 0.000000e+00 : f32
    %106 = vector.shape_cast %93 : vector<1x256xi1> to vector<1x256xi1>
    %107 = vector.broadcast %106 : vector<1x256xi1> to vector<4x256xi1>
    %108 = vector.broadcast %cst_65 : f32 to vector<4x256xf32>
    %109 = arith.select %107, %105, %108 : vector<4x256xi1>, vector<4x256xf32>
    %c0_66 = arith.constant 0 : index
    %c4_67 = arith.constant 4 : index
    %c3_68 = arith.constant 3 : index
    %c0_69 = arith.constant 0 : index
    %110 = vector.load %arg5[%c0_66, %c4_67, %c3_68, %c0_69] : memref<1x8x8x256xf32, #tpu.memory_space<vmem>>, vector<1x4x1x256xf32>
    %111 = vector.shape_cast %110 : vector<1x4x1x256xf32> to vector<4x256xf32>
    %112 = vector.shape_cast %109 : vector<4x256xf32> to vector<1x4x1x256xf32>
    tpu.vector_store %arg5[%c0_66, %c4_67, %c3_68, %c0_69], %112 {strides = array<i32>} : memref<1x8x8x256xf32, #tpu.memory_space<vmem>>, vector<1x4x1x256xf32>,
    %c8_i32_70 = arith.constant 8 : i32
    %113 = arith.muli %arg2, %c8_i32_70 : i32
    %c4_i32 = arith.constant 4 : i32
    %114 = arith.addi %113, %c4_i32 : i32
    %c1_i32_71 = arith.constant 1 : i32
    %115 = arith.muli %114, %c1_i32_71 : i32
    %116 = vector.broadcast %115 : i32 to vector<1x256xi32>
    %117 = arith.cmpi sge, %16, %116 : vector<1x256xi32>
    %c0_72 = arith.constant 0 : index
    %c0_73 = arith.constant 0 : index
    %c0_74 = arith.constant 0 : index
    %118 = vector.load %arg3[%c0_72, %c0_73, %c0_74] : memref<1x4x256xf32, #tpu.memory_space<vmem>>, vector<1x4x256xf32>
    %119 = vector.shape_cast %118 : vector<1x4x256xf32> to vector<4x256xf32>
    %cst_75 = arith.constant 0.000000e+00 : f32
    %120 = vector.shape_cast %117 : vector<1x256xi1> to vector<1x256xi1>
    %121 = vector.broadcast %120 : vector<1x256xi1> to vector<4x256xi1>
    %122 = vector.broadcast %cst_75 : f32 to vector<4x256xf32>
    %123 = arith.select %121, %119, %122 : vector<4x256xi1>, vector<4x256xf32>
    %c0_76 = arith.constant 0 : index
    %c0_77 = arith.constant 0 : index
    %c4_78 = arith.constant 4 : index
    %c0_79 = arith.constant 0 : index
    %124 = vector.load %arg5[%c0_76, %c0_77, %c4_78, %c0_79] : memref<1x8x8x256xf32, #tpu.memory_space<vmem>>, vector<1x4x1x256xf32>
    %125 = vector.shape_cast %124 : vector<1x4x1x256xf32> to vector<4x256xf32>
    %126 = vector.shape_cast %123 : vector<4x256xf32> to vector<1x4x1x256xf32>
    tpu.vector_store %arg5[%c0_76, %c0_77, %c4_78, %c0_79], %126 {strides = array<i32>} : memref<1x8x8x256xf32, #tpu.memory_space<vmem>>, vector<1x4x1x256xf32>,
    %c0_80 = arith.constant 0 : index
    %c0_81 = arith.constant 0 : index
    %c0_82 = arith.constant 0 : index
    %127 = vector.load %arg4[%c0_80, %c0_81, %c0_82] : memref<1x4x256xf32, #tpu.memory_space<vmem>>, vector<1x4x256xf32>
    %128 = vector.shape_cast %127 : vector<1x4x256xf32> to vector<4x256xf32>
    %129 = tpu.dynamic_rotate %128 by %115 dim 1 : vector<4x256xf32>, i32 -> vector<4x256xf32>
    %cst_83 = arith.constant 0.000000e+00 : f32
    %130 = vector.shape_cast %117 : vector<1x256xi1> to vector<1x256xi1>
    %131 = vector.broadcast %130 : vector<1x256xi1> to vector<4x256xi1>
    %132 = vector.broadcast %cst_83 : f32 to vector<4x256xf32>
    %133 = arith.select %131, %129, %132 : vector<4x256xi1>, vector<4x256xf32>
    %c0_84 = arith.constant 0 : index
    %c4_85 = arith.constant 4 : index
    %c4_86 = arith.constant 4 : index
    %c0_87 = arith.constant 0 : index
    %134 = vector.load %arg5[%c0_84, %c4_85, %c4_86, %c0_87] : memref<1x8x8x256xf32, #tpu.memory_space<vmem>>, vector<1x4x1x256xf32>
    %135 = vector.shape_cast %134 : vector<1x4x1x256xf32> to vector<4x256xf32>
    %136 = vector.shape_cast %133 : vector<4x256xf32> to vector<1x4x1x256xf32>
    tpu.vector_store %arg5[%c0_84, %c4_85, %c4_86, %c0_87], %136 {strides = array<i32>} : memref<1x8x8x256xf32, #tpu.memory_space<vmem>>, vector<1x4x1x256xf32>,
    %c8_i32_88 = arith.constant 8 : i32
    %137 = arith.muli %arg2, %c8_i32_88 : i32
    %c5_i32 = arith.constant 5 : i32
    %138 = arith.addi %137, %c5_i32 : i32
    %c1_i32_89 = arith.constant 1 : i32
    %139 = arith.muli %138, %c1_i32_89 : i32
    %140 = vector.broadcast %139 : i32 to vector<1x256xi32>
    %141 = arith.cmpi sge, %16, %140 : vector<1x256xi32>
    %c0_90 = arith.constant 0 : index
    %c0_91 = arith.constant 0 : index
    %c0_92 = arith.constant 0 : index
    %142 = vector.load %arg3[%c0_90, %c0_91, %c0_92] : memref<1x4x256xf32, #tpu.memory_space<vmem>>, vector<1x4x256xf32>
    %143 = vector.shape_cast %142 : vector<1x4x256xf32> to vector<4x256xf32>
    %cst_93 = arith.constant 0.000000e+00 : f32
    %144 = vector.shape_cast %141 : vector<1x256xi1> to vector<1x256xi1>
    %145 = vector.broadcast %144 : vector<1x256xi1> to vector<4x256xi1>
    %146 = vector.broadcast %cst_93 : f32 to vector<4x256xf32>
    %147 = arith.select %145, %143, %146 : vector<4x256xi1>, vector<4x256xf32>
    %c0_94 = arith.constant 0 : index
    %c0_95 = arith.constant 0 : index
    %c5 = arith.constant 5 : index
    %c0_96 = arith.constant 0 : index
    %148 = vector.load %arg5[%c0_94, %c0_95, %c5, %c0_96] : memref<1x8x8x256xf32, #tpu.memory_space<vmem>>, vector<1x4x1x256xf32>
    %149 = vector.shape_cast %148 : vector<1x4x1x256xf32> to vector<4x256xf32>
    %150 = vector.shape_cast %147 : vector<4x256xf32> to vector<1x4x1x256xf32>
    tpu.vector_store %arg5[%c0_94, %c0_95, %c5, %c0_96], %150 {strides = array<i32>} : memref<1x8x8x256xf32, #tpu.memory_space<vmem>>, vector<1x4x1x256xf32>,
    %c0_97 = arith.constant 0 : index
    %c0_98 = arith.constant 0 : index
    %c0_99 = arith.constant 0 : index
    %151 = vector.load %arg4[%c0_97, %c0_98, %c0_99] : memref<1x4x256xf32, #tpu.memory_space<vmem>>, vector<1x4x256xf32>
    %152 = vector.shape_cast %151 : vector<1x4x256xf32> to vector<4x256xf32>
    %153 = tpu.dynamic_rotate %152 by %139 dim 1 : vector<4x256xf32>, i32 -> vector<4x256xf32>
    %cst_100 = arith.constant 0.000000e+00 : f32
    %154 = vector.shape_cast %141 : vector<1x256xi1> to vector<1x256xi1>
    %155 = vector.broadcast %154 : vector<1x256xi1> to vector<4x256xi1>
    %156 = vector.broadcast %cst_100 : f32 to vector<4x256xf32>
    %157 = arith.select %155, %153, %156 : vector<4x256xi1>, vector<4x256xf32>
    %c0_101 = arith.constant 0 : index
    %c4_102 = arith.constant 4 : index
    %c5_103 = arith.constant 5 : index
    %c0_104 = arith.constant 0 : index
    %158 = vector.load %arg5[%c0_101, %c4_102, %c5_103, %c0_104] : memref<1x8x8x256xf32, #tpu.memory_space<vmem>>, vector<1x4x1x256xf32>
    %159 = vector.shape_cast %158 : vector<1x4x1x256xf32> to vector<4x256xf32>
    %160 = vector.shape_cast %157 : vector<4x256xf32> to vector<1x4x1x256xf32>
    tpu.vector_store %arg5[%c0_101, %c4_102, %c5_103, %c0_104], %160 {strides = array<i32>} : memref<1x8x8x256xf32, #tpu.memory_space<vmem>>, vector<1x4x1x256xf32>,
    %c8_i32_105 = arith.constant 8 : i32
    %161 = arith.muli %arg2, %c8_i32_105 : i32
    %c6_i32 = arith.constant 6 : i32
    %162 = arith.addi %161, %c6_i32 : i32
    %c1_i32_106 = arith.constant 1 : i32
    %163 = arith.muli %162, %c1_i32_106 : i32
    %164 = vector.broadcast %163 : i32 to vector<1x256xi32>
    %165 = arith.cmpi sge, %16, %164 : vector<1x256xi32>
    %c0_107 = arith.constant 0 : index
    %c0_108 = arith.constant 0 : index
    %c0_109 = arith.constant 0 : index
    %166 = vector.load %arg3[%c0_107, %c0_108, %c0_109] : memref<1x4x256xf32, #tpu.memory_space<vmem>>, vector<1x4x256xf32>
    %167 = vector.shape_cast %166 : vector<1x4x256xf32> to vector<4x256xf32>
    %cst_110 = arith.constant 0.000000e+00 : f32
    %168 = vector.shape_cast %165 : vector<1x256xi1> to vector<1x256xi1>
    %169 = vector.broadcast %168 : vector<1x256xi1> to vector<4x256xi1>
    %170 = vector.broadcast %cst_110 : f32 to vector<4x256xf32>
    %171 = arith.select %169, %167, %170 : vector<4x256xi1>, vector<4x256xf32>
    %c0_111 = arith.constant 0 : index
    %c0_112 = arith.constant 0 : index
    %c6 = arith.constant 6 : index
    %c0_113 = arith.constant 0 : index
    %172 = vector.load %arg5[%c0_111, %c0_112, %c6, %c0_113] : memref<1x8x8x256xf32, #tpu.memory_space<vmem>>, vector<1x4x1x256xf32>
    %173 = vector.shape_cast %172 : vector<1x4x1x256xf32> to vector<4x256xf32>
    %174 = vector.shape_cast %171 : vector<4x256xf32> to vector<1x4x1x256xf32>
    tpu.vector_store %arg5[%c0_111, %c0_112, %c6, %c0_113], %174 {strides = array<i32>} : memref<1x8x8x256xf32, #tpu.memory_space<vmem>>, vector<1x4x1x256xf32>,
    %c0_114 = arith.constant 0 : index
    %c0_115 = arith.constant 0 : index
    %c0_116 = arith.constant 0 : index
    %175 = vector.load %arg4[%c0_114, %c0_115, %c0_116] : memref<1x4x256xf32, #tpu.memory_space<vmem>>, vector<1x4x256xf32>
    %176 = vector.shape_cast %175 : vector<1x4x256xf32> to vector<4x256xf32>
    %177 = tpu.dynamic_rotate %176 by %163 dim 1 : vector<4x256xf32>, i32 -> vector<4x256xf32>
    %cst_117 = arith.constant 0.000000e+00 : f32
    %178 = vector.shape_cast %165 : vector<1x256xi1> to vector<1x256xi1>
    %179 = vector.broadcast %178 : vector<1x256xi1> to vector<4x256xi1>
    %180 = vector.broadcast %cst_117 : f32 to vector<4x256xf32>
    %181 = arith.select %179, %177, %180 : vector<4x256xi1>, vector<4x256xf32>
    %c0_118 = arith.constant 0 : index
    %c4_119 = arith.constant 4 : index
    %c6_120 = arith.constant 6 : index
    %c0_121 = arith.constant 0 : index
    %182 = vector.load %arg5[%c0_118, %c4_119, %c6_120, %c0_121] : memref<1x8x8x256xf32, #tpu.memory_space<vmem>>, vector<1x4x1x256xf32>
    %183 = vector.shape_cast %182 : vector<1x4x1x256xf32> to vector<4x256xf32>
    %184 = vector.shape_cast %181 : vector<4x256xf32> to vector<1x4x1x256xf32>
    tpu.vector_store %arg5[%c0_118, %c4_119, %c6_120, %c0_121], %184 {strides = array<i32>} : memref<1x8x8x256xf32, #tpu.memory_space<vmem>>, vector<1x4x1x256xf32>,
    %c8_i32_122 = arith.constant 8 : i32
    %185 = arith.muli %arg2, %c8_i32_122 : i32
    %c7_i32 = arith.constant 7 : i32
    %186 = arith.addi %185, %c7_i32 : i32
    %c1_i32_123 = arith.constant 1 : i32
    %187 = arith.muli %186, %c1_i32_123 : i32
    %188 = vector.broadcast %187 : i32 to vector<1x256xi32>
    %189 = arith.cmpi sge, %16, %188 : vector<1x256xi32>
    %c0_124 = arith.constant 0 : index
    %c0_125 = arith.constant 0 : index
    %c0_126 = arith.constant 0 : index
    %190 = vector.load %arg3[%c0_124, %c0_125, %c0_126] : memref<1x4x256xf32, #tpu.memory_space<vmem>>, vector<1x4x256xf32>
    %191 = vector.shape_cast %190 : vector<1x4x256xf32> to vector<4x256xf32>
    %cst_127 = arith.constant 0.000000e+00 : f32
    %192 = vector.shape_cast %189 : vector<1x256xi1> to vector<1x256xi1>
    %193 = vector.broadcast %192 : vector<1x256xi1> to vector<4x256xi1>
    %194 = vector.broadcast %cst_127 : f32 to vector<4x256xf32>
    %195 = arith.select %193, %191, %194 : vector<4x256xi1>, vector<4x256xf32>
    %c0_128 = arith.constant 0 : index
    %c0_129 = arith.constant 0 : index
    %c7 = arith.constant 7 : index
    %c0_130 = arith.constant 0 : index
    %196 = vector.load %arg5[%c0_128, %c0_129, %c7, %c0_130] : memref<1x8x8x256xf32, #tpu.memory_space<vmem>>, vector<1x4x1x256xf32>
    %197 = vector.shape_cast %196 : vector<1x4x1x256xf32> to vector<4x256xf32>
    %198 = vector.shape_cast %195 : vector<4x256xf32> to vector<1x4x1x256xf32>
    tpu.vector_store %arg5[%c0_128, %c0_129, %c7, %c0_130], %198 {strides = array<i32>} : memref<1x8x8x256xf32, #tpu.memory_space<vmem>>, vector<1x4x1x256xf32>,
    %c0_131 = arith.constant 0 : index
    %c0_132 = arith.constant 0 : index
    %c0_133 = arith.constant 0 : index
    %199 = vector.load %arg4[%c0_131, %c0_132, %c0_133] : memref<1x4x256xf32, #tpu.memory_space<vmem>>, vector<1x4x256xf32>
    %200 = vector.shape_cast %199 : vector<1x4x256xf32> to vector<4x256xf32>
    %201 = tpu.dynamic_rotate %200 by %187 dim 1 : vector<4x256xf32>, i32 -> vector<4x256xf32>
    %cst_134 = arith.constant 0.000000e+00 : f32
    %202 = vector.shape_cast %189 : vector<1x256xi1> to vector<1x256xi1>
    %203 = vector.broadcast %202 : vector<1x256xi1> to vector<4x256xi1>
    %204 = vector.broadcast %cst_134 : f32 to vector<4x256xf32>
    %205 = arith.select %203, %201, %204 : vector<4x256xi1>, vector<4x256xf32>
    %c0_135 = arith.constant 0 : index
    %c4_136 = arith.constant 4 : index
    %c7_137 = arith.constant 7 : index
    %c0_138 = arith.constant 0 : index
    %206 = vector.load %arg5[%c0_135, %c4_136, %c7_137, %c0_138] : memref<1x8x8x256xf32, #tpu.memory_space<vmem>>, vector<1x4x1x256xf32>
    %207 = vector.shape_cast %206 : vector<1x4x1x256xf32> to vector<4x256xf32>
    %208 = vector.shape_cast %205 : vector<4x256xf32> to vector<1x4x1x256xf32>
    tpu.vector_store %arg5[%c0_135, %c4_136, %c7_137, %c0_138], %208 {strides = array<i32>} : memref<1x8x8x256xf32, #tpu.memory_space<vmem>>, vector<1x4x1x256xf32>,
    return
  }
  func.func @transform_0(%arg0: i32, %arg1: i32, %arg2: i32) -> (i32, i32, i32) {
    %c0_i32 = arith.constant 0 : i32
    %c0_i32_0 = arith.constant 0 : i32
    return %arg0, %c0_i32, %arg1 : i32, i32, i32
  }
  func.func @transform_1(%arg0: i32, %arg1: i32, %arg2: i32) -> (i32, i32, i32) {
    %c0_i32 = arith.constant 0 : i32
    %c0_i32_0 = arith.constant 0 : i32
    return %arg0, %c0_i32, %arg1 : i32, i32, i32
  }
  func.func @transform_2(%arg0: i32, %arg1: i32, %arg2: i32) -> (i32, i32, i32, i32) {
    %c0_i32 = arith.constant 0 : i32
    %c0_i32_0 = arith.constant 0 : i32
    return %arg0, %c0_i32, %arg2, %arg1 : i32, i32, i32, i32
  }
}

</mosaic_0001>

<bundles_post_ra>
// kernel: tpu_custom_call.1
= control target key start
LH: loop header
LB: loop body
LE: loop exit
PB: predicated region body
PF: predicated region fallthrough
CT: control target
= control target key end

     0   :  { %7 = vsyncpa [#allocation3], 0  ;;  %s2362_s0 = inlined_call_operand.hbm [shape: f32[2,4,256], index: 0, kind: input, shape index: {}]   ;;  %s2363_s1 = inlined_call_operand.hbm [shape: f32[2,4,256], index: 1, kind: input, shape index: {}]   ;;  %s2364_s2 = inlined_call_operand.hbm [shape: f32[2,8,8,256], index: 2, kind: output, shape index: {}]  }
   0x1   :  { %9 = vsyncpa [#allocation3 + $0x1], 0 }
   0x2   :  { %10 = vsyncpa [#allocation6], 0 }
   0x3   :  { %12 = vsyncpa [#allocation6 + $0x1], 0 }
   0x4   :  { %13 = vsyncpa [#allocation4], 0 }
   0x5   :  { %15 = vsyncpa [#allocation4 + $0x1], 0  ;;  %s1745_s9 = smov 0   ;;  %s1747_s10 = smov 0  }
   0x6   :  { %s1749_s11 = smov 0   ;;  %s1751_s12 = smov 0  }
   0x7   :  { %s1753_s13 = smov 0   ;;  %s1755_s14 = smov 0  }
   0x8 LB: > { %s1405_s15 = sadd.s32 4294967295, %s1715_s14   ;;  %s1406_s16 = sadd.s32 4294967294, %s1715_s14   ;;  %s1715_s14 = sphi %s1755_s14, %s21_s14   ;;  %s1711_s13 = sphi %s1753_s13, %s2392_s13   ;;  %s1707_s12 = sphi %s1751_s12, %s2391_s12   ;;  %s1703_s11 = sphi %s1749_s11, %s2390_s11   ;;  %s1699_s10 = sphi %s1747_s10, %s2389_s10   ;;  %s1695_s9 = sphi %s1745_s9, %s2388_s9  }
   0x9   : > { %s40_s17 = sadd.s32 1, %s1711_s13  ;;  %s49_s18 = sadd.s32 1, %s1703_s11 }
   0xa   : > { %p42_p0 = scmp.ge.s32.totalorder %s40_s17, 2  ;;  %p56_p1 = scmp.ne.s32.totalorder %s1703_s11, %s1699_s10 }
   0xb   : > { %p57_p2 = scmp.eq.s32.totalorder %s1715_s14, 0  ;;  %p62_p3 = scmp.ne.s32.totalorder %s1699_s10, %s1695_s9 }
   0xc   : > { %s2394_s17 = smov (%p42_p0, %s40_s17), 0  ;;  %p63_p5 = scmp.eq.s32.totalorder %s1405_s15, 0 }
   0xd   : > { %p1786_p4 = por %p57_p2, %p56_p1  ;;  %s44_s20 = ssub.s32 %s1711_s13, %s2394_s17 }
   0xe   : > { %p118_p6 = scmp.eq.s32.totalorder %s1405_s15, 1  ;;  %p47_p7 = scmp.eq.s32.totalorder %s44_s20, 0 }
   0xf   : > { %p1792_p8 = por %p63_p5, %p62_p3  ;;  %p124_p10 = scmp.eq.s32.totalorder %s1406_s16, 1 }
  0x10   : > { %p1796_p9 = por %p118_p6, %p56_p1  ;;  %p1507_p13 = scmp.lt.s32.totalorder %s1715_s14, 2 }
  0x11   : > { %s2371_s21 = scalar_select %p1792_p8, 1, 0 }
  0x12   : > { %s2372_s22 = scalar_select %p1796_p9, 1, 0 }
  0x13   : > { %s1801_s23 = scalar_select %p47_p7, %s1703_s11, %s49_s18  }
  0x14   : > { %p1803_p11 = por %p124_p10, %p62_p3  ;;  %s1810_s25 = sand.u32 1, %s1703_s11  }
  0x15   : > { %s1409_s26 = sshll.u32 %s1810_s25, 3  ;;  %s1487_s27 = sshll.u32 %s1711_s13, 7 }
  0x16   : > { %s2373_s24 = scalar_select %p1803_p11, 1, 0 }
  0x17   : > { %s1819_s30 = scalar_lea.hbm %s2362_s0, %s1487_s27  ;;  %s148_s3 = scalar_lea.vmem [#allocation2], %s1409_s26 }
  0x18   : > { %s158_s4 = sshll.u32 %s148_s3, 4  ;;  %p1827_p0 = pnand %p1507_p13, %p1786_p4  ;;  %s1823_s4 = int_to_ptr.vmem [resolvable:$true] %s158_s4 }
  0x19   : > { %s145_s6 = scalar_lea.sflag [#allocation3], %s1810_s25  ;;  %s1569_s7 = scalar_lea.hbm %s1819_s30, 128 }
  0x1a   : > { %p1570_p3 = scmp.ne.s32.totalorder %s1819_s30, %s1569_s7  ;;  %p1571_p5 = pneg %p1827_p0 }
  0x1b   : > { %s1574_s16 = scalar_lea.hbm %s2362_s0, 256  ;;  %p1575_p4 = scmp.lt.u32.totalorder %s1819_s30, %s2362_s0 }
  0x1c   : > { %p1572_p6 = pnand %p1571_p5, %p1570_p3  ;;  %p1576_p10 = scmp.lt.u32.totalorder %s1574_s16, %s1569_s7 }
  0x1d   : > { %p1578_p12 = scmp.lt.u32.totalorder %s1569_s7, %s1819_s30 }
  0x1e   : > { %p1573_p7 = pneg %p1572_p6  ;;  %p1577_p13 = por %p1576_p10, %p1575_p4 }
  0x20   : > { %p1579_p1 = por %p1578_p12, %p1577_p13 }
  0x22   : > { %p1580_p2 = pnand %p1579_p1, %p1573_p7 }
  0x24   : > { %1583 = shalt.err (!%p1580_p2)
}
  0x25   : > { %s1584_s20 = scalar_lea.vmem %s1823_s4, 128  ;;  %s1717_s28 = smov [#allocation2]  }
  0x26   : > { %p1585_p3 = scmp.ne.s32.totalorder %s1823_s4, %s1584_s20  ;;  %s1589_s29 = sshll.u32 %s1717_s28, 4  ;;  %s1590_s29 = int_to_ptr.vmem [resolvable:$false] %s1589_s29 }
  0x27   : > { %s1591_s3 = scalar_lea.vmem %s1590_s29, 256  ;;  %p1592_p9 = scmp.lt.s32.totalorder %s1823_s4, %s1590_s29 }
  0x28   : > { %p1587_p6 = pnand %p1585_p3, %p1571_p5  ;;  %p1593_p4 = scmp.lt.s32.totalorder %s1591_s3, %s1584_s20 }
  0x2a   : > { %p1588_p11 = pneg %p1587_p6  ;;  %p1594_p10 = por %p1593_p4, %p1592_p9 }
  0x2c   : > { %p1595_p12 = pnand %p1594_p10, %p1588_p11 }
  0x2e   : > { %1598 = shalt.err (!%p1595_p12)
}
  0x2f   : > { %1499 = dma.hbm_to_vmem [thread:$0]  (!%p1827_p0), %s1819_s30, 128, %s1823_s4, %s145_s6  }
  0x30   : > { %p2375_p1 = scmp.lt.s32.totalorder %s1715_s14, 3  ;;  %p2376_p2 = scmp.ge.s32.totalorder %s1715_s14, 1 }
  0x31   : > { %s1872_s16 = scalar_lea.hbm %s2363_s1, %s1487_s27  ;;  %s169_s18 = scalar_lea.vmem [#allocation5], %s1409_s26 }
  0x32   : > { %p1863_p7 = pnand %p2376_p2, %p2375_p1  ;;  %s179_s19 = sshll.u32 %s169_s18, 4  ;;  %s180_s19 = int_to_ptr.vmem [resolvable:$true] %s179_s19 }
  0x33   : > { %s166_s30 = scalar_lea.sflag [#allocation6], %s1810_s25  ;;  %s1599_s4 = scalar_lea.hbm %s1872_s16, 128 }
  0x34   : > { %s2377_s7 = scalar_select %p1863_p7, 1, 0 }
  0x35   : > { %p1600_p9 = scmp.ne.s32.totalorder %s1872_s16, %s1599_s4  ;;  %s1604_s27 = scalar_lea.hbm %s2363_s1, 256 }
  0x36   : > { %p1605_p3 = scmp.lt.u32.totalorder %s1872_s16, %s2363_s1  ;;  %p1606_p6 = scmp.lt.u32.totalorder %s1604_s27, %s1599_s4 }
  0x37   : > { %p1602_p11 = pnand %p1600_p9, %p1571_p5  ;;  %p1608_p10 = scmp.lt.u32.totalorder %s1599_s4, %s1872_s16 }
  0x38   : > { %p1607_p4 = por %p1606_p6, %p1605_p3 }
  0x39   : > { %p1603_p13 = pneg %p1602_p11 }
  0x3a   : > { %p1609_p12 = por %p1608_p10, %p1607_p4 }
  0x3c   : > { %p1610_p1 = pnand %p1609_p12, %p1603_p13 }
  0x3e   : > { %1613 = shalt.err (!%p1610_p1)
}
  0x3f   : > { %s1614_s25 = scalar_lea.vmem %s180_s19, 128  ;;  %s1718_s26 = smov [#allocation5]  }
  0x40   : > { %p1615_p2 = scmp.ne.s32.totalorder %s180_s19, %s1614_s25  ;;  %s1619_s3 = sshll.u32 %s1718_s26, 4  ;;  %s1620_s3 = int_to_ptr.vmem [resolvable:$false] %s1619_s3 }
  0x41   : > { %s1621_s8 = scalar_lea.vmem %s1620_s3, 256  ;;  %p1622_p8 = scmp.lt.s32.totalorder %s180_s19, %s1620_s3 }
  0x42   : > { %p1617_p9 = pnand %p1615_p2, %p1571_p5  ;;  %p1623_p7 = scmp.lt.s32.totalorder %s1621_s8, %s1614_s25 }
  0x44   : > { %p1618_p11 = pneg %p1617_p9  ;;  %p1624_p3 = por %p1623_p7, %p1622_p8 }
  0x46   : > { %p1625_p6 = pnand %p1624_p3, %p1618_p11 }
  0x48   : > { %1628 = shalt.err (!%p1625_p6)
}
  0x49   : > { %1502 = dma.hbm_to_vmem [thread:$0]  (!%p1827_p0), %s1872_s16, 128, %s180_s19, %s166_s30  }
  0x4a   : > { %p2378_p13 = scmp.ne.s32.totalorder %s2377_s7, 0 }
  0x4b   : > { %s1899_s15 = sand.u32 (!%p2378_p13), 1, %s1699_s10   ;;  %p2379_p5 = scmp.ne.s32.totalorder (!%p2378_p13), %s2371_s21, 0 }
  0x4c   : > { %188 = sbr.rel (%p2378_p13) target bundleno = 254 (0xfe), region = 28  ;;  %s1416_s18 = sshll.u32 (!%p2378_p13), %s1899_s15, 3 }
  0x4d   : > { %s191_s4 = scalar_lea.sflag (!%p2378_p13), [#allocation3], %s1899_s15  ;;  %s194_s6 = scalar_lea.vmem (!%p2378_p13), [#allocation2], %s1416_s18 }
  0x53   : > { %1682 = dma.done.wait (%p2379_p5), %s191_s4, 128  }
  0x54   : > { %1684 = vsyncadd (%p2379_p5), %s191_s4, 4294967168  ;;  %s200_s5 = scalar_lea.sflag [#allocation6], %s1899_s15  ;;  %s203_s16 = scalar_lea.vmem [#allocation5], %s1416_s18 }
  0x55   : > { %1686 = dma.done.wait (%p2379_p5), %s200_s5, 128  }
  0x56   : > { %1688 = vsyncadd (%p2379_p5), %s200_s5, 4294967168  ;;  %v232_v0 = vlaneseq  ;;  %v1719_v2 = vmov 1966171168   ;;  %v1920_v7 = vld [vmem:[%s203_s16] sm:$0xff]  ;;  %v1923_v10 = vld [vmem:[%s194_s6] sm:$0xff]  ;;  %s1720_s21 = smov 2  }
  0x57   : > { %v277_v3 = vunpack.c.l.s4 %v1719_v2  ;;  %570 = vrot.lane.b32.xlu1 %v1920_v7, %s1720_s21  ;;  %v1928_v11 = vcombine.high %v1920_v7, %v1920_v7  ;;  %s1721_s7 = smov 1   ;;  %v1933_v12 = vcombine.high %v1923_v10, %v1923_v10  ;;  %s1722_s19 = smov 3  }
  0x58   : > { %v1912_v1 = vand.u32 127, %v232_v0  ;;  %v280_v9 = vshrl.u32 %v232_v0, 7  ;;  %448 = vrot.lane.b32.xlu0 %v1920_v7, %s1721_s7  ;;  %s1418_s30 = sshll.u32 %s1899_s15, 7  ;;  %vm1955_vm4 = vcmp.lt.s32.totalorder %v232_v0, 256  ;;  %s1723_s27 = smov 4  }
  0x59   : > { %v278_v8 = vunpack.c.0.s8 %v277_v3  ;;  %s1979_s20 = scalar_lea.vmem [#allocation7], %s1418_s30  ;;  %s1724_s28 = smov 5   ;;  %v275_v60 = vcombine.low %v1923_v10, %v1933_v12 }
  0x5a   : > { %v234_v4 = vadd.s32 128, %v1912_v1  ;;  %v1916_v5 = vand.u32 15, %v1912_v1  ;;  %s1725_s29 = smov 6   ;;  %s1726_s25 = smov 7   ;;  %vm575_vm15 = vcmp.lt.s32.totalorder %v1912_v1, 2 }
  0x5b   : > { %v1944_v15 = vsub.s32 %v278_v8, %v280_v9  ;;  %572 = vrot.lane.b32.xlu1 %v1928_v11, %s1720_s21  ;;  %v343_v8 = vcombine.low %v1920_v7, %v1928_v11  ;;  %s1489_s26 = sshll.u32 %s1707_s12, 11  ;;  %s1256_s3 = sshll.u32 %s1979_s20, 4  ;;  %s2304_s3 = int_to_ptr.vmem [resolvable:$true] %s1256_s3 }
  0x5c   : > { %v1918_v6 = vand.u32 15, %v234_v4  ;;  %vm508_vm0 = vcmp.ge.s32.totalorder %v1916_v5, 2  ;;  %vm630_vm2 = vcmp.ge.s32.totalorder %v1916_v5, 3  ;;  %692 = vrot.lane.b32.xlu0 %v1920_v7, %s1722_s19  ;;  %vm386_vm5 = vcmp.ge.s32.totalorder %v1916_v5, 1  ;;  %s2302_s4 = scalar_lea.hbm %s2364_s2, %s1489_s26  ;;  %s1239_s12 = scalar_lea.sflag [#allocation4], %s1899_s15 }
  0x5d   : > { %v518_v13 = vsel %vm508_vm0, %v1923_v10, 0.0  ;;  %v640_v17 = vsel %vm630_vm2, %v1923_v10, 0.0  ;;  %vm752_vm7 = vcmp.ge.s32.totalorder %v1916_v5, 4  ;;  %v396_v25 = vsel %vm386_vm5, %v1923_v10, 0.0  ;;  %s1629_s6 = scalar_lea.vmem %s2304_s3, 2048  ;;  %p2385_p0 = scmp.ne.s32.totalorder %s2372_s22, 0 }
  0x5e   : > { %vm509_vm1 = vcmp.ge.s32.totalorder %v1918_v6, 2  ;;  %vm631_vm3 = vcmp.ge.s32.totalorder %v1918_v6, 3  ;;  %vm387_vm6 = vcmp.ge.s32.totalorder %v1918_v6, 1  ;;  %vm753_vm8 = vcmp.ge.s32.totalorder %v1918_v6, 4  ;;  %p1630_p8 = scmp.ne.s32.totalorder %s2304_s3, %s1629_s6  ;;  %s1727_s5 = smov [#allocation7]  }
  0x5f   : > { %v519_v14 = vsel %vm509_vm1, %v1933_v12, 0.0  ;;  %v641_v18 = vsel %vm631_vm3, %v1933_v12, 0.0  ;;  %v397_v26 = vsel %vm387_vm6, %v1933_v12, 0.0  ;;  %694 = vrot.lane.b32.xlu1 %v1928_v11, %s1722_s19  ;;  %v762_v30 = vsel %vm752_vm7, %v1923_v10, 0.0  ;;  %s1633_s16 = sshll.u32 %s1727_s5, 4  ;;  %s1634_s16 = int_to_ptr.vmem [resolvable:$false] %s1633_s16 }
  0x60   : > { %v522_v16 = vcombine.low %v518_v13, %v519_v14  ;;  %v644_v19 = vcombine.low %v640_v17, %v641_v18  ;;  %450 = vrot.lane.b32.xlu0 %v1928_v11, %s1721_s7  ;;  %v400_v29 = vcombine.low %v396_v25, %v397_v26  ;;  %v763_v33 = vsel %vm753_vm8, %v1933_v12, 0.0  ;;  %p1631_p7 = pnand %p1630_p8, %p2385_p0  ;;  %s1635_s21 = scalar_lea.vmem %s1634_s16, 4096 }
  0x61   : > { %vm874_vm9 = vcmp.ge.s32.totalorder %v1916_v5, 5  ;;  %v766_v37 = vcombine.low %v762_v30, %v763_v33  ;;  %vm875_vm10 = vcmp.ge.s32.totalorder %v1918_v6, 5  ;;  %vm996_vm11 = vcmp.ge.s32.totalorder %v1916_v5, 6  ;;  %p1636_p10 = scmp.lt.s32.totalorder %s2304_s3, %s1634_s16  ;;  %p1637_p12 = scmp.lt.s32.totalorder %s1635_s21, %s1629_s6 }
  0x62   : > { %v529_v21 = vrot.slane %v522_v16, %v1944_v15  ;;  %v651_v22 = vrot.slane %v644_v19, %v1944_v15  ;;  %v407_v36 = vrot.slane %v400_v29, %v1944_v15  ;;  %vm2369_vm12 = vcmp.ge.s32.totalorder %v1918_v6, 6  ;;  %p1632_p4 = pneg %p1631_p7 }
  0x63   : > { %816 = vrot.lane.b32.xlu1 %v1928_v11, %s1723_s27  ;;  %v884_v42 = vsel %vm874_vm9, %v1923_v10, 0.0  ;;  %v773_v43 = vrot.slane %v766_v37, %v1944_v15  ;;  %v885_v44 = vsel %vm875_vm10, %v1933_v12, 0.0  ;;  %v1006_v45 = vsel %vm996_vm11, %v1923_v10, 0.0  ;;  %p1638_p1 = por %p1637_p12, %p1636_p10 }
  0x64   : > { %v530_v23 = vcombine.high %v529_v21, %v529_v21  ;;  %v537_v24 = vrot.slane %v529_v21, %v1944_v15  ;;  %v652_v27 = vcombine.high %v651_v22, %v651_v22  ;;  %v659_v28 = vrot.slane %v651_v22, %v1944_v15  ;;  %814 = vrot.lane.b32.xlu0 %v1920_v7, %s1723_s27 }
  0x65   : > { %v408_v40 = vcombine.high %v407_v36, %v407_v36  ;;  %v415_v41 = vrot.slane %v407_v36, %v1944_v15  ;;  %v1007_v46 = vsel %vm2369_vm12, %v1933_v12, 0.0  ;;  %v888_v49 = vcombine.low %v884_v42, %v885_v44  ;;  %p1639_p2 = pnand %p1638_p1, %p1632_p4 }
  0x66   : > { %v544_v31 = vrot.slane %v530_v23, %v1944_v15  ;;  %v545_v32 = vcombine.high %v537_v24, %v537_v24  ;;  %1434 = vst.msk [vmem:[%s1979_s20 + $0x2] ss:$8 sm:$0x3] %vm1955_vm4, %v537_v24  ;;  %v666_v34 = vrot.slane %v652_v27, %v1944_v15  ;;  %v667_v35 = vcombine.high %v659_v28, %v659_v28 }
  0x67   : > { %1442 = vst.msk [vmem:[%s1979_s20 + $0x3] ss:$8 sm:$0x3] %vm1955_vm4, %v659_v28  ;;  %v422_v47 = vrot.slane %v408_v40, %v1944_v15  ;;  %v423_v48 = vcombine.high %v415_v41, %v415_v41  ;;  %1426 = vst.msk [vmem:[%s1979_s20 + $0x1] ss:$8 sm:$0x3] %vm1955_vm4, %v415_v41  ;;  %v1010_v50 = vcombine.low %v1006_v45, %v1007_v46  ;;  %938 = vrot.lane.b32.xlu1 %v1928_v11, %s1724_s28 }
  0x68   : > { %v546_v38 = vcombine.high %v544_v31, %v544_v31  ;;  %1435 = vst.msk [vmem:[%s1979_s20 + $0x12] ss:$8 sm:$0x3] %vm1955_vm4, %v544_v31  ;;  %1436 = vst.msk [vmem:[%s1979_s20 + $0x22] ss:$8 sm:$0x3] %vm1955_vm4, %v545_v32  ;;  %v668_v39 = vcombine.high %v666_v34, %v666_v34  ;;  %v774_v51 = vcombine.high %v773_v43, %v773_v43  ;;  %936 = vrot.lane.b32.xlu0 %v1920_v7, %s1724_s28 }
  0x69   : > { %1443 = vst.msk [vmem:[%s1979_s20 + $0x13] ss:$8 sm:$0x3] %vm1955_vm4, %v666_v34  ;;  %1444 = vst.msk [vmem:[%s1979_s20 + $0x23] ss:$8 sm:$0x3] %vm1955_vm4, %v667_v35  ;;  %v781_v52 = vrot.slane %v773_v43, %v1944_v15  ;;  %v424_v53 = vcombine.high %v422_v47, %v422_v47  ;;  %v895_v54 = vrot.slane %v888_v49, %v1944_v15 }
  0x6a   : > { %1437 = vst.msk [vmem:[%s1979_s20 + $0x32] ss:$8 sm:$0x3] %vm1955_vm4, %v546_v38  ;;  %1445 = vst.msk [vmem:[%s1979_s20 + $0x33] ss:$8 sm:$0x3] %vm1955_vm4, %v668_v39  ;;  %v1017_v55 = vrot.slane %v1010_v50, %v1944_v15  ;;  %v788_v57 = vrot.slane %v774_v51, %v1944_v15  ;;  %v282_v4 = vrot.slane %v275_v60, %v1944_v15 }
  0x6b   : > { %vm2368_vm13 = vcmp.ge.s32.totalorder %v1916_v5, 7  ;;  %vm2367_vm14 = vcmp.ge.s32.totalorder %v1918_v6, 7  ;;  %1427 = vst.msk [vmem:[%s1979_s20 + $0x11] ss:$8 sm:$0x3] %vm1955_vm4, %v422_v47  ;;  %v789_v58 = vcombine.high %v781_v52, %v781_v52  ;;  %v896_v61 = vcombine.high %v895_v54, %v895_v54  ;;  %1060 = vrot.lane.b32.xlu1 %v1928_v11, %s1725_s29 }
  0x6c   : > { %1428 = vst.msk [vmem:[%s1979_s20 + $0x21] ss:$8 sm:$0x3] %vm1955_vm4, %v423_v48  ;;  %v1128_v56 = vsel %vm2368_vm13, %v1923_v10, 0.0  ;;  %v1129_v59 = vsel %vm2367_vm14, %v1933_v12, 0.0  ;;  %v903_v62 = vrot.slane %v895_v54, %v1944_v15  ;;  %v1018_v63 = vcombine.high %v1017_v55, %v1017_v55  ;;  %1058 = vrot.lane.b32.xlu0 %v1920_v7, %s1725_s29 }
  0x6d   : > { %1450 = vst.msk [vmem:[%s1979_s20 + $0x4] ss:$8 sm:$0x3] %vm1955_vm4, %v781_v52  ;;  %1429 = vst.msk [vmem:[%s1979_s20 + $0x31] ss:$8 sm:$0x3] %vm1955_vm4, %v424_v53  ;;  %v1025_v0 = vrot.slane %v1017_v55, %v1944_v15  ;;  %v790_v2 = vcombine.high %v788_v57, %v788_v57  ;;  %v1132_v3 = vcombine.low %v1128_v56, %v1129_v59 }
  0x6e   : > { %1451 = vst.msk [vmem:[%s1979_s20 + $0x14] ss:$8 sm:$0x3] %vm1955_vm4, %v788_v57  ;;  %1452 = vst.msk [vmem:[%s1979_s20 + $0x24] ss:$8 sm:$0x3] %vm1955_vm4, %v789_v58  ;;  %v910_v9 = vrot.slane %v896_v61, %v1944_v15  ;;  %v911_v10 = vcombine.high %v903_v62, %v903_v62  ;;  %v1032_v12 = vrot.slane %v1018_v63, %v1944_v15 }
  0x6f   : > { %1458 = vst.msk [vmem:[%s1979_s20 + $0x5] ss:$8 sm:$0x3] %vm1955_vm4, %v903_v62  ;;  %1466 = vst.msk [vmem:[%s1979_s20 + $0x6] ss:$8 sm:$0x3] %vm1955_vm4, %v1025_v0  ;;  %v1033_v13 = vcombine.high %v1025_v0, %v1025_v0  ;;  %v1139_v14 = vrot.slane %v1132_v3, %v1944_v15  ;;  %v283_v16 = vcombine.high %v282_v4, %v282_v4  ;;  %1182 = vrot.lane.b32.xlu1 %v1928_v11, %s1726_s25 }
  0x70   : > { %1453 = vst.msk [vmem:[%s1979_s20 + $0x34] ss:$8 sm:$0x3] %vm1955_vm4, %v790_v2  ;;  %v290_v17 = vrot.slane %v282_v4, %v1944_v15  ;;  %v912_v18 = vcombine.high %v910_v9, %v910_v9  ;;  %1459 = vst.msk [vmem:[%s1979_s20 + $0x15] ss:$8 sm:$0x3] %vm1955_vm4, %v910_v9  ;;  %v1034_v19 = vcombine.high %v1032_v12, %v1032_v12  ;;  %1180 = vrot.lane.b32.xlu0 %v1920_v7, %s1726_s25 }
  0x71   : > { %1460 = vst.msk [vmem:[%s1979_s20 + $0x25] ss:$8 sm:$0x3] %vm1955_vm4, %v911_v10  ;;  %1467 = vst.msk [vmem:[%s1979_s20 + $0x16] ss:$8 sm:$0x3] %vm1955_vm4, %v1032_v12  ;;  %v350_v21 = vrot.slane %v343_v8, %v1944_v15  ;;  %v1140_v22 = vcombine.high %v1139_v14, %v1139_v14  ;;  %v1147_v23 = vrot.slane %v1139_v14, %v1944_v15 }
  0x72   : > { %1468 = vst.msk [vmem:[%s1979_s20 + $0x26] ss:$8 sm:$0x3] %vm1955_vm4, %v1033_v13  ;;  %v297_v24 = vrot.slane %v283_v16, %v1944_v15  ;;  %v298_v25 = vcombine.high %v290_v17, %v290_v17  ;;  %308 = vst.msk [vmem:[%s1979_s20] ss:$8 sm:$0x3] %vm1955_vm4, %v290_v17 }
  0x73   : > { %1461 = vst.msk [vmem:[%s1979_s20 + $0x35] ss:$8 sm:$0x3] %vm1955_vm4, %v912_v18  ;;  %1469 = vst.msk [vmem:[%s1979_s20 + $0x36] ss:$8 sm:$0x3] %vm1955_vm4, %v1034_v19  ;;  %v351_v26 = vcombine.high %v350_v21, %v350_v21  ;;  %v358_v27 = vrot.slane %v350_v21, %v1944_v15  ;;  %v1154_v28 = vrot.slane %v1140_v22, %v1944_v15 }
  0x74   : > { %v1155_v11 = vcombine.high %v1147_v23, %v1147_v23  ;;  %1474 = vst.msk [vmem:[%s1979_s20 + $0x7] ss:$8 sm:$0x3] %vm1955_vm4, %v1147_v23  ;;  %v299_v7 = vcombine.high %v297_v24, %v297_v24  ;;  %1419 = vst.msk [vmem:[%s1979_s20 + $0x10] ss:$8 sm:$0x3] %vm1955_vm4, %v297_v24 }
  0x75   : > { %1420 = vst.msk [vmem:[%s1979_s20 + $0x20] ss:$8 sm:$0x3] %vm1955_vm4, %v298_v25  ;;  %v365_v29 = vrot.slane %v351_v26, %v1944_v15  ;;  %v366_v30 = vcombine.high %v358_v27, %v358_v27  ;;  %1422 = vst.msk [vmem:[%s1979_s20 + $0x40] ss:$8 sm:$0x3] %vm1955_vm4, %v358_v27  ;;  %v1156_v31 = vcombine.high %v1154_v28, %v1154_v28 }
  0x76   : > { %1475 = vst.msk [vmem:[%s1979_s20 + $0x17] ss:$8 sm:$0x3] %vm1955_vm4, %v1154_v28  ;;  %1476 = vst.msk [vmem:[%s1979_s20 + $0x27] ss:$8 sm:$0x3] %vm1955_vm4, %v1155_v11 }
  0x77   : > { %1421 = vst.msk [vmem:[%s1979_s20 + $0x30] ss:$8 sm:$0x3] %vm1955_vm4, %v299_v7  ;;  %v367_v32 = vcombine.high %v365_v29, %v365_v29  ;;  %1423 = vst.msk [vmem:[%s1979_s20 + $0x50] ss:$8 sm:$0x3] %vm1955_vm4, %v365_v29 }
  0x78   : > { %1424 = vst.msk [vmem:[%s1979_s20 + $0x60] ss:$8 sm:$0x3] %vm1955_vm4, %v366_v30  ;;  %1477 = vst.msk [vmem:[%s1979_s20 + $0x37] ss:$8 sm:$0x3] %vm1955_vm4, %v1156_v31 }
  0x79   : > { %1425 = vst.msk [vmem:[%s1979_s20 + $0x70] ss:$8 sm:$0x3] %vm1955_vm4, %v367_v32  ;;  %vm697_vm14 = vcmp.lt.s32.totalorder %v1912_v1, 3  ;;  %vm453_vm13 = vcmp.lt.s32.totalorder %v1912_v1, 1  ;;  %vm819_vm12 = vcmp.lt.s32.totalorder %v1912_v1, 4 }
  0xc9   : > { %v571_v33 = vpop.permute.xlu1 %570 }
  0xca   : > { %v449_v34 = vpop.permute.xlu0 %448 }
  0xcd   : > { %v573_v35 = vpop.permute.xlu1 %572 }
  0xce   : > { %v693_v36 = vpop.permute.xlu0 %692  ;;  %v576_v37 = vsel %vm575_vm15, %v571_v33, %v573_v35  ;;  %v577_v38 = vsel %vm575_vm15, %v573_v35, %v571_v33 }
  0xcf   : > { %v583_v39 = vsel %vm508_vm0, %v577_v38, 0.0  ;;  %v584_v40 = vsel %vm509_vm1, %v576_v37, 0.0  ;;  %vm941_vm0 = vcmp.lt.s32.totalorder %v1912_v1, 5  ;;  %vm1063_vm1 = vcmp.lt.s32.totalorder %v1912_v1, 6 }
  0xd0   : > { %v587_v41 = vcombine.low %v583_v39, %v584_v40 }
  0xd1   : > { %v695_v42 = vpop.permute.xlu1 %694 }
  0xd2   : > { %v451_v43 = vpop.permute.xlu0 %450  ;;  %v594_v44 = vrot.slane %v587_v41, %v1944_v15  ;;  %v698_v45 = vsel %vm697_vm14, %v693_v36, %v695_v42  ;;  %v699_v46 = vsel %vm697_vm14, %v695_v42, %v693_v36 }
  0xd3   : > { %v454_v47 = vsel %vm453_vm13, %v449_v34, %v451_v43  ;;  %v705_v48 = vsel %vm630_vm2, %v699_v46, 0.0  ;;  %v706_v49 = vsel %vm631_vm3, %v698_v45, 0.0  ;;  %v455_v50 = vsel %vm453_vm13, %v451_v43, %v449_v34 }
  0xd4   : > { %v462_v51 = vsel %vm387_vm6, %v454_v47, 0.0  ;;  %v595_v52 = vcombine.high %v594_v44, %v594_v44  ;;  %v602_v53 = vrot.slane %v594_v44, %v1944_v15  ;;  %v709_v54 = vcombine.low %v705_v48, %v706_v49 }
  0xd5   : > { %v461_v55 = vsel %vm386_vm5, %v455_v50, 0.0  ;;  %v817_v57 = vpop.permute.xlu1 %816  ;;  %vm1185_vm2 = vcmp.lt.s32.totalorder %v1912_v1, 7  ;;  %vm2382_vm3 = vcmp.ge.s32.totalorder %v1918_v6, 6  ;;  %vm2383_vm5 = vcmp.ge.s32.totalorder %v1916_v5, 7 }
  0xd6   : > { %v465_v56 = vcombine.low %v461_v55, %v462_v51  ;;  %v815_v58 = vpop.permute.xlu0 %814  ;;  %v609_v59 = vrot.slane %v595_v52, %v1944_v15  ;;  %v610_v60 = vcombine.high %v602_v53, %v602_v53  ;;  %1438 = vst.msk [vmem:[%s1979_s20 + $0x42] ss:$8 sm:$0x3] %vm1955_vm4, %v602_v53  ;;  %v716_v61 = vrot.slane %v709_v54, %v1944_v15 }
  0xd7   : > { %v820_v62 = vsel %vm819_vm12, %v815_v58, %v817_v57  ;;  %v821_v0 = vsel %vm819_vm12, %v817_v57, %v815_v58  ;;  %vm2384_vm6 = vcmp.ge.s32.totalorder %v1918_v6, 7 }
  0xd8   : > { %v472_v63 = vrot.slane %v465_v56, %v1944_v15  ;;  %v828_v2 = vsel %vm753_vm8, %v820_v62, 0.0  ;;  %v611_v3 = vcombine.high %v609_v59, %v609_v59  ;;  %1439 = vst.msk [vmem:[%s1979_s20 + $0x52] ss:$8 sm:$0x3] %vm1955_vm4, %v609_v59  ;;  %v717_v4 = vcombine.high %v716_v61, %v716_v61 }
  0xd9   : > { %1440 = vst.msk [vmem:[%s1979_s20 + $0x62] ss:$8 sm:$0x3] %vm1955_vm4, %v610_v60  ;;  %v724_v8 = vrot.slane %v716_v61, %v1944_v15  ;;  %v827_v9 = vsel %vm752_vm7, %v821_v0, 0.0  ;;  %v939_v14 = vpop.permute.xlu1 %938 }
  0xda   : > { %v473_v10 = vcombine.high %v472_v63, %v472_v63  ;;  %v480_v12 = vrot.slane %v472_v63, %v1944_v15  ;;  %v831_v13 = vcombine.low %v827_v9, %v828_v2  ;;  %v937_v16 = vpop.permute.xlu0 %936  ;;  %1441 = vst.msk [vmem:[%s1979_s20 + $0x72] ss:$8 sm:$0x3] %vm1955_vm4, %v611_v3  ;;  %v731_v17 = vrot.slane %v717_v4, %v1944_v15 }
  0xdb   : > { %v732_v18 = vcombine.high %v724_v8, %v724_v8  ;;  %1446 = vst.msk [vmem:[%s1979_s20 + $0x43] ss:$8 sm:$0x3] %vm1955_vm4, %v724_v8  ;;  %v942_v19 = vsel %vm941_vm0, %v937_v16, %v939_v14  ;;  %v943_v21 = vsel %vm941_vm0, %v939_v14, %v937_v16 }
  0xdc   : > { %v487_v22 = vrot.slane %v473_v10, %v1944_v15  ;;  %v488_v23 = vcombine.high %v480_v12, %v480_v12  ;;  %1430 = vst.msk [vmem:[%s1979_s20 + $0x41] ss:$8 sm:$0x3] %vm1955_vm4, %v480_v12  ;;  %v838_v24 = vrot.slane %v831_v13, %v1944_v15  ;;  %v949_v25 = vsel %vm874_vm9, %v943_v21, 0.0 }
  0xdd   : > { %v733_v26 = vcombine.high %v731_v17, %v731_v17  ;;  %1447 = vst.msk [vmem:[%s1979_s20 + $0x53] ss:$8 sm:$0x3] %vm1955_vm4, %v731_v17  ;;  %1448 = vst.msk [vmem:[%s1979_s20 + $0x63] ss:$8 sm:$0x3] %vm1955_vm4, %v732_v18  ;;  %v1061_v30 = vpop.permute.xlu1 %1060 }
  0xde   : > { %v950_v27 = vsel %vm875_vm10, %v942_v19, 0.0  ;;  %v489_v28 = vcombine.high %v487_v22, %v487_v22  ;;  %1431 = vst.msk [vmem:[%s1979_s20 + $0x51] ss:$8 sm:$0x3] %vm1955_vm4, %v487_v22  ;;  %v839_v11 = vcombine.high %v838_v24, %v838_v24  ;;  %v846_v7 = vrot.slane %v838_v24, %v1944_v15  ;;  %v1059_v31 = vpop.permute.xlu0 %1058 }
  0xdf   : > { %1432 = vst.msk [vmem:[%s1979_s20 + $0x61] ss:$8 sm:$0x3] %vm1955_vm4, %v488_v23  ;;  %v953_v29 = vcombine.low %v949_v25, %v950_v27  ;;  %1449 = vst.msk [vmem:[%s1979_s20 + $0x73] ss:$8 sm:$0x3] %vm1955_vm4, %v733_v26  ;;  %v1064_v32 = vsel %vm1063_vm1, %v1059_v31, %v1061_v30  ;;  %v1065_v33 = vsel %vm1063_vm1, %v1061_v30, %v1059_v31 }
  0xe0   : > { %1433 = vst.msk [vmem:[%s1979_s20 + $0x71] ss:$8 sm:$0x3] %vm1955_vm4, %v489_v28  ;;  %v853_v34 = vrot.slane %v839_v11, %v1944_v15  ;;  %v854_v35 = vcombine.high %v846_v7, %v846_v7  ;;  %1454 = vst.msk [vmem:[%s1979_s20 + $0x44] ss:$8 sm:$0x3] %vm1955_vm4, %v846_v7 }
  0xe1   : > { %v960_v36 = vrot.slane %v953_v29, %v1944_v15  ;;  %v1071_v37 = vsel %vm996_vm11, %v1065_v33, 0.0  ;;  %v1072_v38 = vsel %vm2382_vm3, %v1064_v32, 0.0  ;;  %v1183_v43 = vpop.permute.xlu1 %1182 }
  0xe2   : > { %v855_v39 = vcombine.high %v853_v34, %v853_v34  ;;  %1455 = vst.msk [vmem:[%s1979_s20 + $0x54] ss:$8 sm:$0x3] %vm1955_vm4, %v853_v34  ;;  %1456 = vst.msk [vmem:[%s1979_s20 + $0x64] ss:$8 sm:$0x3] %vm1955_vm4, %v854_v35  ;;  %v1075_v42 = vcombine.low %v1071_v37, %v1072_v38  ;;  %v1181_v44 = vpop.permute.xlu0 %1180 }
  0xe3   : > { %v961_v40 = vcombine.high %v960_v36, %v960_v36  ;;  %v968_v41 = vrot.slane %v960_v36, %v1944_v15  ;;  %v1186_v45 = vsel %vm1185_vm2, %v1181_v44, %v1183_v43  ;;  %v1187_v46 = vsel %vm1185_vm2, %v1183_v43, %v1181_v44 }
  0xe4   : > { %1457 = vst.msk [vmem:[%s1979_s20 + $0x74] ss:$8 sm:$0x3] %vm1955_vm4, %v855_v39  ;;  %v1082_v49 = vrot.slane %v1075_v42, %v1944_v15  ;;  %v1193_v50 = vsel %vm2383_vm5, %v1187_v46, 0.0  ;;  %v1194_v1 = vsel %vm2384_vm6, %v1186_v45, 0.0 }
  0xe5   : > { %v975_v47 = vrot.slane %v961_v40, %v1944_v15  ;;  %v976_v48 = vcombine.high %v968_v41, %v968_v41  ;;  %1462 = vst.msk [vmem:[%s1979_s20 + $0x45] ss:$8 sm:$0x3] %vm1955_vm4, %v968_v41  ;;  %v1197_v54 = vcombine.low %v1193_v50, %v1194_v1 }
  0xe6   : > { %v1083_v52 = vcombine.high %v1082_v49, %v1082_v49  ;;  %v1090_v53 = vrot.slane %v1082_v49, %v1944_v15 }
  0xe7   : > { %v977_v51 = vcombine.high %v975_v47, %v975_v47  ;;  %1463 = vst.msk [vmem:[%s1979_s20 + $0x55] ss:$8 sm:$0x3] %vm1955_vm4, %v975_v47  ;;  %1464 = vst.msk [vmem:[%s1979_s20 + $0x65] ss:$8 sm:$0x3] %vm1955_vm4, %v976_v48  ;;  %v1204_v55 = vrot.slane %v1197_v54, %v1944_v15 }
  0xe8   : > { %v1097_v5 = vrot.slane %v1083_v52, %v1944_v15  ;;  %v1098_v6 = vcombine.high %v1090_v53, %v1090_v53  ;;  %1470 = vst.msk [vmem:[%s1979_s20 + $0x46] ss:$8 sm:$0x3] %vm1955_vm4, %v1090_v53 }
  0xe9   : > { %1465 = vst.msk [vmem:[%s1979_s20 + $0x75] ss:$8 sm:$0x3] %vm1955_vm4, %v977_v51  ;;  %v1205_v57 = vcombine.high %v1204_v55, %v1204_v55  ;;  %v1212_v58 = vrot.slane %v1204_v55, %v1944_v15 }
  0xea   : > { %v1099_v56 = vcombine.high %v1097_v5, %v1097_v5  ;;  %1471 = vst.msk [vmem:[%s1979_s20 + $0x56] ss:$8 sm:$0x3] %vm1955_vm4, %v1097_v5  ;;  %1472 = vst.msk [vmem:[%s1979_s20 + $0x66] ss:$8 sm:$0x3] %vm1955_vm4, %v1098_v6 }
  0xeb   : > { %v1219_v59 = vrot.slane %v1205_v57, %v1944_v15  ;;  %v1220_v60 = vcombine.high %v1212_v58, %v1212_v58  ;;  %1478 = vst.msk [vmem:[%s1979_s20 + $0x47] ss:$8 sm:$0x3] %vm1955_vm4, %v1212_v58 }
  0xec   : > { %1473 = vst.msk [vmem:[%s1979_s20 + $0x76] ss:$8 sm:$0x3] %vm1955_vm4, %v1099_v56 }
  0xed   : > { %v1221_v61 = vcombine.high %v1219_v59, %v1219_v59  ;;  %1479 = vst.msk [vmem:[%s1979_s20 + $0x57] ss:$8 sm:$0x3] %vm1955_vm4, %v1219_v59  ;;  %1480 = vst.msk [vmem:[%s1979_s20 + $0x67] ss:$8 sm:$0x3] %vm1955_vm4, %v1220_v60 }
  0xef   : > { %1481 = vst.msk [vmem:[%s1979_s20 + $0x77] ss:$8 sm:$0x3] %vm1955_vm4, %v1221_v61 }
  0xf0   : > { %1642 = shalt.err (!%p1639_p2)
}
  0xf1   : > { %s1643_s7 = scalar_lea.hbm %s2302_s4, 2048  ;;  %s1647_s20 = scalar_lea.hbm %s2364_s2, 4096 }
  0xf2   : > { %p1644_p9 = scmp.ne.s32.totalorder %s2302_s4, %s1643_s7  ;;  %p1648_p6 = scmp.lt.u32.totalorder %s2302_s4, %s2364_s2 }
  0xf3   : > { %p1649_p13 = scmp.lt.u32.totalorder %s1647_s20, %s1643_s7  ;;  %p1651_p8 = scmp.lt.u32.totalorder %s1643_s7, %s2302_s4 }
  0xf4   : > { %p1645_p11 = pnand %p1644_p9, %p2385_p0 }
  0xf5   : > { %p1650_p5 = por %p1649_p13, %p1648_p6 }
  0xf6   : > { %p1646_p3 = pneg %p1645_p11 }
  0xf7   : > { %p1652_p7 = por %p1651_p8, %p1650_p5 }
  0xf9   : > { %p1653_p4 = pnand %p1652_p7, %p1646_p3 }
  0xfb   : > { %1656 = shalt.err (!%p1653_p4)
}
  0xfc   : > { %s1728_s29 = smov 256   ;;  %s1729_s25 = smov 16  }
  0xfd   : > { %1494 = dma.vmem_to_hbm [thread:$0]  (%p2385_p0), %s2304_s3, 2048, %s2302_s4, %s1239_s12, %s1728_s29, %s1728_s29, %s1729_s25  }
  0xfe PF: > { %s1271_s26 = sand.u32 1, %s1695_s9   ;;  %p2386_p10 = scmp.ne.s32.totalorder %s2373_s24, 0 }
  0xff   : > { %p2387_p12 = scmp.ge.s32.totalorder %s1715_s14, 2  ;;  %s1272_s8 = scalar_lea.sflag [#allocation4], %s1271_s26 }
 0x101   : > { %p1504_p1 = pnand %p2387_p12, %p2386_p10 }
 0x103   : > { %1690 = dma.done.wait (!%p1504_p1), %s1272_s8, 2048  }
 0x104   : > { %1692 = vsyncadd (!%p1504_p1), %s1272_s8, 4294965248  ;;  %s21_s14 = sadd.s32 1, %s1715_s14   ;;  %s2388_s9 = smov %s1699_s10 }
 0x105   : > { %p18_p2 = scmp.ge.s32.totalorder %s21_s14, 4   ;;  %s2389_s10 = smov %s1703_s11 }
 0x106   : > { %s2390_s11 = smov %s1801_s23  ;;  %s2391_s12 = smov %s1711_s13 }
 0x107   : > { %s2392_s13 = smov %s2394_s17  ;;  %20 = sbr.rel (!%p18_p2) target bundleno = 8 (0x8), region = 149 }
 0x10e   :  { %1277 = vsyncpa [#allocation3], 1 }
 0x10f   :  { %1279 = vsyncpa [#allocation3 + $0x1], 1 }
 0x110   :  { %1280 = vsyncpa [#allocation6], 1 }
 0x111   :  { %1282 = vsyncpa [#allocation6 + $0x1], 1 }
 0x112   :  { %1283 = vsyncpa [#allocation4], 1 }
 0x113   :  { %1285 = vsyncpa [#allocation4 + $0x1], 1 }

</bundles_post_ra>
